<compile_context>
chip_gen: v5e
topology: v5e:2x2
jax: 0.10.0
libtpu: 0.0.40
codegen_flags: <defaults>
</compile_context>

<pallas_src>
from functools import partial

import jax
import jax.numpy as jnp
from jax.experimental import pallas as pl
from jax.experimental.pallas import tpu as pltpu


LANE = 128


def _round_up(x, m):
    return (x + m - 1) // m * m


# ----------------------------------------------------------------------------
# Pallas kernel: conv-as-matmul + ReLU + GAP accumulation, fused cls+head matmul
# ----------------------------------------------------------------------------
def betagl_kernel(x_ref, wconv_ref, bconv_ref, wcomb_ref, bcomb_ref,
                  fm_ref, comb_ref, acc_ref, *, inv_p):
    # grid = (batch tiles [parallel], spatial tiles [arbitrary / reduction])
    k = pl.program_id(1)

    @pl.when(k == 0)
    def _init():
        acc_ref[...] = jnp.zeros_like(acc_ref)

    tb, tp, ck = x_ref.shape
    # conv as one big matmul on the MXU (bf16 operands, f32 accumulate):
    # (TILE_B*TILE_P, CK) @ (CK, F_pad); bias + ReLU on the VPU in f32.
    x = x_ref[...].reshape(tb * tp, ck)                       # bf16
    y = jnp.dot(x, wconv_ref[...],
                preferred_element_type=jnp.float32)           # (TB*TP, F_pad) f32
    y = jnp.maximum(y + bconv_ref[...], 0.0)

    # partial global-average-pool: running per-batch spatial sum in f32 scratch.
    acc_ref[...] += jnp.sum(y.reshape(tb, tp, -1), axis=1)    # (TILE_B, F_pad)

    @pl.when(k == pl.num_programs(1) - 1)
    def _finalize():
        fm = acc_ref[...] * inv_p                             # (TILE_B, F_pad) GAP mean
        fm_ref[...] = fm.astype(fm_ref.dtype)                 # dense 128-wide store
        # fused classifier + head: ONE (TILE_B,128)@(128,128) matmul + dense store.
        comb = jnp.dot(fm.astype(jnp.bfloat16), wcomb_ref[...],
                       preferred_element_type=jnp.float32) + bcomb_ref[...]
        comb_ref[...] = comb.astype(comb_ref.dtype)


# ----------------------------------------------------------------------------
# Glue: im2col + packing + pallas_call wrapper
# ----------------------------------------------------------------------------
def _im2col_3x3(x_nhwc_like):
    """NCHW -> (B, H*W, 9*Cin) patches for a 3x3 conv, padding=1, stride=1."""
    B, C, H, W = x_nhwc_like.shape
    x = jnp.transpose(x_nhwc_like, (0, 2, 3, 1))              # NHWC
    xp = jnp.pad(x, ((0, 0), (1, 1), (1, 1), (0, 0)))
    shifts = [xp[:, dh:dh + H, dw:dw + W, :]
              for dh in range(3) for dw in range(3)]           # order (dh, dw, c)
    patches = jnp.concatenate(shifts, axis=-1)                 # (B, H, W, 9*C)
    return patches.reshape(B, H * W, 9 * C)


def _pick_tile_p(P, tile_b, ck, f_pad, vmem_budget):
    """Largest spatial tile (multiple of 8, divisor of P) fitting the VMEM budget."""
    # per spatial row: double-buffered bf16 patches + f32 conv activation row.
    per_row = tile_b * (2 * ck * 2 + f_pad * 4)
    tile = min(P, max(8, vmem_budget // max(per_row, 1)))
    tile = (tile // 8) * 8
    while tile > 8 and P % tile != 0:
        tile -= 8
    assert tile >= 8 and P % tile == 0
    return tile


def betagl_forward(x_nchw, params):
    """Returns dict(feature, feature_map, logits) matching ResnetOutput fields."""
    B, C, H, W = x_nchw.shape
    P = H * W
    CK = params["w_conv"].shape[0]                             # 9 * Cin (unpadded)
    F = params["w_conv"].shape[1]
    NC = params["w_cls"].shape[1]
    OUT = NC + F

    F_pad = _round_up(F, LANE)
    OUT_pad = _round_up(OUT, LANE)

    assert P % 8 == 0, "H*W must be a multiple of 8 (ragged spatial not handled)"
    if B <= 8:
        TILE_B = B
    else:
        assert B % 8 == 0, "batch must be <= 8 or a multiple of 8"
        TILE_B = 8
    TILE_P = _pick_tile_p(P, TILE_B, CK, F_pad, vmem_budget=16 << 20)
    KT = P // TILE_P
    BT = B // TILE_B

    # --- host-side packing (layout plumbing, outside the hot loop) ----------------
    # Cast once to bf16 BEFORE the pad/concat so the big im2col stream stays bf16.
    patches = _im2col_3x3(x_nchw.astype(jnp.bfloat16))         # (B, P, CK) bf16, unpadded CK

    wconv = jnp.pad(params["w_conv"],
                    ((0, 0), (0, F_pad - F))).astype(jnp.bfloat16)        # (CK, F_pad)
    bconv = jnp.pad(params["b_conv"], ((0, 0), (0, F_pad - F)))           # (1, F_pad) f32
    wcomb = jnp.concatenate([params["w_cls"], params["w_head"]], axis=1)  # (F, NC+F)
    wcomb = jnp.pad(wcomb, ((0, F_pad - F), (0, OUT_pad - OUT))).astype(jnp.bfloat16)
    bcomb = jnp.concatenate([params["b_cls"], params["b_head"]], axis=1)  # (1, NC+F)
    bcomb = jnp.pad(bcomb, ((0, 0), (0, OUT_pad - OUT)))                  # (1, OUT_pad) f32

    kernel = partial(betagl_kernel, inv_p=float(1.0 / P))

    # VMEM limit derived from the actual tile footprint (+headroom), valid on v7x.
    tile_bytes = (
        2 * TILE_B * TILE_P * CK * 2                       # patches (double-buffered bf16)
        + 2 * (CK * F_pad * 2 + F_pad * 4)                 # conv weight + bias
        + 2 * (F_pad * OUT_pad * 2 + OUT_pad * 4)          # fused cls+head weight + bias
        + 2 * TILE_B * (F_pad + OUT_pad) * 4               # outputs (double-buffered f32)
        + TILE_B * F_pad * 4                               # GAP accumulator scratch
        + TILE_B * TILE_P * F_pad * 4                      # in-kernel f32 conv activation
    )
    vmem_limit = int(min(max(_round_up(2 * tile_bytes, 1 << 20), 4 << 20), 48 << 20))

    bytes_accessed = int(patches.size * 2 + wconv.size * 2 + wcomb.size * 2
                         + (bconv.size + bcomb.size) * 4
                         + B * (F_pad + OUT_pad) * 4)
    flops = int(2 * B * P * CK * F_pad + 2 * B * F_pad * OUT_pad)

    fm_full, comb_full = pl.pallas_call(
        kernel,
        out_shape=(
            jax.ShapeDtypeStruct((B, F_pad), jnp.float32),     # feature_map (F-padded)
            jax.ShapeDtypeStruct((B, OUT_pad), jnp.float32),   # [logits | feature] (padded)
        ),
        grid=(BT, KT),
        in_specs=[
            pl.BlockSpec((TILE_B, TILE_P, CK), lambda b, k: (b, k, 0)),    # patches
            pl.BlockSpec((CK, F_pad), lambda b, k: (0, 0)),                # conv weight
            pl.BlockSpec((1, F_pad), lambda b, k: (0, 0)),                 # conv bias
            pl.BlockSpec((F_pad, OUT_pad), lambda b, k: (0, 0)),           # fused cls+head weight
            pl.BlockSpec((1, OUT_pad), lambda b, k: (0, 0)),               # fused cls+head bias
        ],
        out_specs=(
            pl.BlockSpec((TILE_B, F_pad), lambda b, k: (b, 0)),
            pl.BlockSpec((TILE_B, OUT_pad), lambda b, k: (b, 0)),
        ),
        scratch_shapes=[pltpu.VMEM((TILE_B, F_pad), jnp.float32)],   # f32 GAP accumulator
        compiler_params=pltpu.CompilerParams(
            dimension_semantics=("parallel", "arbitrary"),
            vmem_limit_bytes=vmem_limit,
        ),
        cost_estimate=pl.CostEstimate(
            flops=flops, transcendentals=0, bytes_accessed=bytes_accessed),
    )(patches, wconv, bconv, wcomb, bcomb)

    fm = fm_full[:, :F]
    logits = comb_full[:, :NC]
    feat = comb_full[:, NC:NC + F]
    return {"feature": feat, "feature_map": fm, "logits": logits}


# ----------------------------------------------------------------------------
# Deterministic parameter construction (synthetic, no checkpoint load)
# ----------------------------------------------------------------------------
def make_params(c_in, feature_dim, n_classes, key):
    k = jax.random.split(key, 6)
    # PyTorch conv weight (F, Cin, 3, 3) -> patch order (dh, dw, c) -> (9*Cin, F)
    w_conv_pt = 0.1 * jax.random.normal(k[0], (feature_dim, c_in, 3, 3), jnp.float32)
    w_conv = jnp.transpose(w_conv_pt, (2, 3, 1, 0)).reshape(9 * c_in, feature_dim)
    b_conv = 0.1 * jax.random.normal(k[1], (1, feature_dim), jnp.float32)
    # PyTorch Linear weight (out, in) -> kernel expects (in, out)
    w_cls_pt = 0.1 * jax.random.normal(k[2], (n_classes, feature_dim), jnp.float32)
    b_cls = 0.1 * jax.random.normal(k[3], (1, n_classes), jnp.float32)
    w_head_pt = 0.1 * jax.random.normal(k[4], (feature_dim, feature_dim), jnp.float32)
    b_head = 0.1 * jax.random.normal(k[5], (1, feature_dim), jnp.float32)
    return {
        "w_conv": w_conv, "b_conv": b_conv,
        "w_cls": w_cls_pt.T, "b_cls": b_cls,
        "w_head": w_head_pt.T, "b_head": b_head,
    }


def reference_forward(x_nchw, params):
    """Pure-JAX f32 reference of the same math (correctness check)."""
    patches = _im2col_3x3(x_nchw)
    y = jnp.maximum(
        jnp.einsum("bpc,cf->bpf", patches, params["w_conv"]) + params["b_conv"], 0.0)
    fm = jnp.mean(y, axis=1)
    logits = fm @ params["w_cls"] + params["b_cls"]
    feat = fm @ params["w_head"] + params["b_head"]
    return {"feature": feat, "feature_map": fm, "logits": logits}


if __name__ == "__main__":
    # small shapes consistent with the module's forward
    B, C_IN, H, W = 2, 4, 16, 16
    FEATURE_DIM, N_CLASSES = 32, 10

    key = jax.random.PRNGKey(0)
    kx, kp = jax.random.split(key)
    x = jax.random.normal(kx, (B, C_IN, H, W), jnp.float32)   # NCHW, like PyTorch
    params = make_params(C_IN, FEATURE_DIM, N_CLASSES, kp)

    out = betagl_forward(x, params)
    jax.block_until_ready(out)

    ref = reference_forward(x, params)
    # bf16 MXU operands w/ f32 accumulation -> looser tolerance than pure f32.
    for name in ("feature", "feature_map", "logits"):
        assert jnp.allclose(out[name], ref[name], atol=2e-2, rtol=2e-2), name

    assert out["feature"].shape == (B, FEATURE_DIM)
    assert out["feature_map"].shape == (B, FEATURE_DIM)
    assert out["logits"].shape == (B, N_CLASSES)

    print("KERNEL_OK")
</pallas_src>

<mosaic_0001>
module attributes {stable_mosaic.version = 11 : i64} {
  func.func @betagl_kernel(%arg0: i32, %arg1: i32, %arg2: memref<2x256x36xbf16, #tpu.memory_space<vmem>>, %arg3: memref<36x128xbf16, #tpu.memory_space<vmem>>, %arg4: memref<1x128xf32, #tpu.memory_space<vmem>>, %arg5: memref<128x128xbf16, #tpu.memory_space<vmem>>, %arg6: memref<1x128xf32, #tpu.memory_space<vmem>>, %arg7: memref<2x128xf32, #tpu.memory_space<vmem>>, %arg8: memref<2x128xf32, #tpu.memory_space<vmem>>, %arg9: memref<2x128xf32, #tpu.memory_space<vmem>>) attributes {dimension_semantics = [#tpu.dimension_semantics<parallel>, #tpu.dimension_semantics<arbitrary>], iteration_bounds = array<i64: 1, 1>, scalar_prefetch = 0 : i64, scratch_operands = 1 : i64, tpu.core_type = #tpu.core_type<tc>, window_params = [{transform_indices = @transform_0, window_bounds = array<i64: 2, 256, 36>}, {pipeline_mode = #tpu.pipeline_mode<synchronous>, transform_indices = @transform_1, window_bounds = array<i64: 36, 128>}, {pipeline_mode = #tpu.pipeline_mode<synchronous>, transform_indices = @transform_2, window_bounds = array<i64: 1, 128>}, {pipeline_mode = #tpu.pipeline_mode<synchronous>, transform_indices = @transform_3, window_bounds = array<i64: 128, 128>}, {pipeline_mode = #tpu.pipeline_mode<synchronous>, transform_indices = @transform_4, window_bounds = array<i64: 1, 128>}, {transform_indices = @transform_5, window_bounds = array<i64: 2, 128>}, {transform_indices = @transform_6, window_bounds = array<i64: 2, 128>}]} {
    %c0_i32 = arith.constant 0 : i32
    %0 = arith.cmpi eq, %arg1, %c0_i32 : i32
    %1 = arith.extui %0 : i1 to i32
    %c0_i32_0 = arith.constant 0 : i32
    %2 = arith.cmpi ne, %1, %c0_i32_0 : i32
    scf.if %2 {
      %cst_15 = arith.constant 0.000000e+00 : f32
      %20 = vector.broadcast %cst_15 : f32 to vector<2x128xf32>
      %c0_16 = arith.constant 0 : index
      %c0_17 = arith.constant 0 : index
      %21 = vector.load %arg9[%c0_16, %c0_17] : memref<2x128xf32, #tpu.memory_space<vmem>>, vector<2x128xf32>
      tpu.vector_store %arg9[%c0_16, %c0_17], %20 {strides = array<i32>} : memref<2x128xf32, #tpu.memory_space<vmem>>, vector<2x128xf32>,
    } else {
    }
    %c0 = arith.constant 0 : index
    %c0_1 = arith.constant 0 : index
    %c0_2 = arith.constant 0 : index
    %3 = vector.load %arg2[%c0, %c0_1, %c0_2] : memref<2x256x36xbf16, #tpu.memory_space<vmem>>, vector<2x256x36xbf16>
    %4 = vector.shape_cast %3 : vector<2x256x36xbf16> to vector<512x36xbf16>
    %c0_3 = arith.constant 0 : index
    %c0_4 = arith.constant 0 : index
    %5 = vector.load %arg3[%c0_3, %c0_4] : memref<36x128xbf16, #tpu.memory_space<vmem>>, vector<36x128xbf16>
    %cst = arith.constant dense<0.000000e+00> : vector<512x128xf32>
    %6 = tpu.matmul %4, %5, %cst {dimension_numbers = #tpu.dot_dimension_numbers<[1], [0], [0], [1], [0, 0, 1, 1], [], []>} : vector<512x36xbf16>, vector<36x128xbf16>, vector<512x128xf32> -> vector<512x128xf32>
    %c0_5 = arith.constant 0 : index
    %c0_6 = arith.constant 0 : index
    %7 = vector.load %arg4[%c0_5, %c0_6] : memref<1x128xf32, #tpu.memory_space<vmem>>, vector<1x128xf32>
    %8 = vector.broadcast %7 : vector<1x128xf32> to vector<512x128xf32>
    %9 = arith.addf %6, %8 : vector<512x128xf32>
    %cst_7 = arith.constant 0.000000e+00 : f32
    %10 = vector.broadcast %cst_7 : f32 to vector<512x128xf32>
    %11 = arith.maximumf %9, %10 : vector<512x128xf32>
    %c0_8 = arith.constant 0 : index
    %c0_9 = arith.constant 0 : index
    %12 = vector.load %arg9[%c0_8, %c0_9] : memref<2x128xf32, #tpu.memory_space<vmem>>, vector<2x128xf32>
    %13 = vector.shape_cast %11 : vector<512x128xf32> to vector<2x256x128xf32>
    %cst_10 = arith.constant dense<0.000000e+00> : vector<2x128xf32>
    %14 = vector.multi_reduction <add>, %13, %cst_10 [1] : vector<2x256x128xf32> to vector<2x128xf32>
    %15 = arith.addf %12, %14 : vector<2x128xf32>
    %c0_11 = arith.constant 0 : index
    %c0_12 = arith.constant 0 : index
    %16 = vector.load %arg9[%c0_11, %c0_12] : memref<2x128xf32, #tpu.memory_space<vmem>>, vector<2x128xf32>
    tpu.vector_store %arg9[%c0_11, %c0_12], %15 {strides = array<i32>} : memref<2x128xf32, #tpu.memory_space<vmem>>, vector<2x128xf32>,
    %c0_i32_13 = arith.constant 0 : i32
    %17 = arith.cmpi eq, %arg1, %c0_i32_13 : i32
    %18 = arith.extui %17 : i1 to i32
    %c0_i32_14 = arith.constant 0 : i32
    %19 = arith.cmpi ne, %18, %c0_i32_14 : i32
    scf.if %19 {
      %c0_15 = arith.constant 0 : index
      %c0_16 = arith.constant 0 : index
      %20 = vector.load %arg9[%c0_15, %c0_16] : memref<2x128xf32, #tpu.memory_space<vmem>>, vector<2x128xf32>
      %cst_17 = arith.constant 3.906250e-03 : f32
      %21 = vector.broadcast %cst_17 : f32 to vector<2x128xf32>
      %22 = arith.mulf %20, %21 : vector<2x128xf32>
      %c0_18 = arith.constant 0 : index
      %c0_19 = arith.constant 0 : index
      %23 = vector.load %arg7[%c0_18, %c0_19] : memref<2x128xf32, #tpu.memory_space<vmem>>, vector<2x128xf32>
      tpu.vector_store %arg7[%c0_18, %c0_19], %22 {strides = array<i32>} : memref<2x128xf32, #tpu.memory_space<vmem>>, vector<2x128xf32>,
      %24 = arith.truncf %22 : vector<2x128xf32> to vector<2x128xbf16>
      %c0_20 = arith.constant 0 : index
      %c0_21 = arith.constant 0 : index
      %25 = vector.load %arg5[%c0_20, %c0_21] : memref<128x128xbf16, #tpu.memory_space<vmem>>, vector<128x128xbf16>
      %cst_22 = arith.constant dense<0.000000e+00> : vector<2x128xf32>
      %26 = tpu.matmul %24, %25, %cst_22 {dimension_numbers = #tpu.dot_dimension_numbers<[1], [0], [0], [1], [0, 0, 1, 1], [], []>} : vector<2x128xbf16>, vector<128x128xbf16>, vector<2x128xf32> -> vector<2x128xf32>
      %c0_23 = arith.constant 0 : index
      %c0_24 = arith.constant 0 : index
      %27 = vector.load %arg6[%c0_23, %c0_24] : memref<1x128xf32, #tpu.memory_space<vmem>>, vector<1x128xf32>
      %28 = vector.broadcast %27 : vector<1x128xf32> to vector<2x128xf32>
      %29 = arith.addf %26, %28 : vector<2x128xf32>
      %c0_25 = arith.constant 0 : index
      %c0_26 = arith.constant 0 : index
      %30 = vector.load %arg8[%c0_25, %c0_26] : memref<2x128xf32, #tpu.memory_space<vmem>>, vector<2x128xf32>
      tpu.vector_store %arg8[%c0_25, %c0_26], %29 {strides = array<i32>} : memref<2x128xf32, #tpu.memory_space<vmem>>, vector<2x128xf32>,
    } else {
    }
    return
  }
  func.func @transform_0(%arg0: i32, %arg1: i32) -> (i32, i32, i32) {
    %c0_i32 = arith.constant 0 : i32
    %c0_i32_0 = arith.constant 0 : i32
    return %arg0, %arg1, %c0_i32 : i32, i32, i32
  }
  func.func @transform_1(%arg0: i32, %arg1: i32) -> (i32, i32) {
    %c0_i32 = arith.constant 0 : i32
    %c0_i32_0 = arith.constant 0 : i32
    %c0_i32_1 = arith.constant 0 : i32
    return %c0_i32, %c0_i32_0 : i32, i32
  }
  func.func @transform_2(%arg0: i32, %arg1: i32) -> (i32, i32) {
    %c0_i32 = arith.constant 0 : i32
    %c0_i32_0 = arith.constant 0 : i32
    %c0_i32_1 = arith.constant 0 : i32
    return %c0_i32, %c0_i32_0 : i32, i32
  }
  func.func @transform_3(%arg0: i32, %arg1: i32) -> (i32, i32) {
    %c0_i32 = arith.constant 0 : i32
    %c0_i32_0 = arith.constant 0 : i32
    %c0_i32_1 = arith.constant 0 : i32
    return %c0_i32, %c0_i32_0 : i32, i32
  }
  func.func @transform_4(%arg0: i32, %arg1: i32) -> (i32, i32) {
    %c0_i32 = arith.constant 0 : i32
    %c0_i32_0 = arith.constant 0 : i32
    %c0_i32_1 = arith.constant 0 : i32
    return %c0_i32, %c0_i32_0 : i32, i32
  }
  func.func @transform_5(%arg0: i32, %arg1: i32) -> (i32, i32) {
    %c0_i32 = arith.constant 0 : i32
    %c0_i32_0 = arith.constant 0 : i32
    return %arg0, %c0_i32 : i32, i32
  }
  func.func @transform_6(%arg0: i32, %arg1: i32) -> (i32, i32) {
    %c0_i32 = arith.constant 0 : i32
    %c0_i32_0 = arith.constant 0 : i32
    return %arg0, %c0_i32 : i32, i32
  }
}

</mosaic_0001>

<bundles_post_ra>
// kernel: tpu_custom_call.1
= control target key start
LH: loop header
LB: loop body
LE: loop exit
PB: predicated region body
PF: predicated region fallthrough
CT: control target
= control target key end

     0   :  { %12 = vsyncpa [#allocation4], 0  ;;  %vm375_vm0 = vcmask 1041408   ;;  %s1481_s0 = inlined_call_operand.vmem [shape: bf16[2,256,36], index: 0, kind: input, shape index: {}]   ;;  %s1482_s1 = inlined_call_operand.vmem [shape: bf16[36,128], index: 1, kind: input, shape index: {}]   ;;  %s1483_s2 = inlined_call_operand.vmem [shape: f32[1,128], index: 2, kind: input, shape index: {}]   ;;  %s1484_s3 = inlined_call_operand.vmem [shape: bf16[128,128], index: 3, kind: input, shape index: {}]   ;;  %s1485_s4 = inlined_call_operand.vmem [shape: f32[1,128], index: 4, kind: input, shape index: {}]   ;;  %s1486_s5 = inlined_call_operand.hbm [shape: f32[2,128], index: 5, kind: output, shape index: {0}]   ;;  %s1487_s6 = inlined_call_operand.hbm [shape: f32[2,128], index: 6, kind: output, shape index: {1}]  }
   0x1   :  { %v98_v0 = vld [vmem:[%s1482_s1 + $0x10] sm:$0x3] }
   0x2   :  { %v272_v1 = vunpack.c.l.b16 %v98_v0 }
   0x4   :  { %v275_v2 = vpack.c.b16 %v272_v1, %v272_v1 }
   0x5   :  { %13 = vsyncpa [#allocation6], 0  ;;  %v1048_v4 = vld [vmem:[%s1482_s1 + $0x8] sm:$0xff]  ;;  %v1047_v5 = vld [vmem:[%s1482_s1] sm:$0xff]  ;;  %vm278_vm1 = vcmask 293888   ;;  %vm689_vm2 = vcmask 1041409  }
   0x6   :  { %v377_v3 = vsel %vm375_vm0, %v275_v2, 0  ;;  %v1015_v6 = vld [vmem:[%s1481_s0] sm:$0xff]  ;;  %v1029_v7 = vld [vmem:[%s1481_s0 + $0x70] sm:$0xff]  ;;  %v1038_v8 = vld [vmem:[%s1481_s0 + $0xb8] sm:$0xff]  ;;  %s790_s10 = sshll.u32 %s1486_s5, 4  ;;  %s1125_s13 = smov [#allocation5]   ;;  %s791_s10 = int_to_ptr.hbm [resolvable:$true] %s790_s10 }
   0x7   :  { %384 = vmatpush.bf16.msra.mxu0 %v377_v3  ;;  %1058 = vmatpush.bf16.msra.mxu2 %v377_v3  ;;  %v1016_v9 = vld [vmem:[%s1481_s0 + $0x8] sm:$0xff]  ;;  %v1030_v10 = vld [vmem:[%s1481_s0 + $0x78] sm:$0xff]  ;;  %v1039_v11 = vld [vmem:[%s1481_s0 + $0xc0] sm:$0xff]  ;;  %s799_s14 = sshll.u32 %s1125_s13, 4  ;;  %s801_s17 = sshll.u32 %s1487_s6, 4  ;;  %s800_s14 = int_to_ptr.vmem [resolvable:$true] %s799_s14  ;;  %s802_s17 = int_to_ptr.hbm [resolvable:$true] %s801_s17 }
   0x8   :  { %1059 = vmatpush.bf16.msra.mxu3 %v377_v3  ;;  %1057 = vmatpush.bf16.msra.mxu1 %v377_v3  ;;  %v1017_v12 = vld [vmem:[%s1481_s0 + $0x10] sm:$0xff]  ;;  %v1031_v13 = vld [vmem:[%s1481_s0 + $0x80] sm:$0xff]  ;;  %v1040_v14 = vld [vmem:[%s1481_s0 + $0xc8] sm:$0xff] }
   0x9   :  { %v1018_v15 = vld [vmem:[%s1481_s0 + $0x18] sm:$0xff]  ;;  %v1032_v16 = vld [vmem:[%s1481_s0 + $0x88] sm:$0xff]  ;;  %v1041_v17 = vld [vmem:[%s1481_s0 + $0xd0] sm:$0xff] }
   0xa   :  { %v1024_v18 = vld [vmem:[%s1481_s0 + $0x48] sm:$0xff]  ;;  %v1019_v19 = vld [vmem:[%s1481_s0 + $0x20] sm:$0xff]  ;;  %v1033_v20 = vld [vmem:[%s1481_s0 + $0x90] sm:$0xff] }
   0xb   :  { %385 = vmatpush.bf16.msra.mxu0 %v1048_v4  ;;  %1061 = vmatpush.bf16.msra.mxu2 %v1048_v4  ;;  %v1042_v21 = vld [vmem:[%s1481_s0 + $0xd8] sm:$0xff]  ;;  %v1025_v22 = vld [vmem:[%s1481_s0 + $0x50] sm:$0xff]  ;;  %v1020_v23 = vld [vmem:[%s1481_s0 + $0x28] sm:$0xff] }
   0xc   :  { %1062 = vmatpush.bf16.msra.mxu3 %v1048_v4  ;;  %1060 = vmatpush.bf16.msra.mxu1 %v1048_v4  ;;  %v1034_v24 = vld [vmem:[%s1481_s0 + $0x98] sm:$0xff]  ;;  %v1043_v25 = vld [vmem:[%s1481_s0 + $0xe0] sm:$0xff]  ;;  %v1021_v27 = vld [vmem:[%s1481_s0 + $0x30] sm:$0xff] }
   0xd   :  { %v1026_v26 = vld [vmem:[%s1481_s0 + $0x58] sm:$0xff]  ;;  %v1035_v28 = vld [vmem:[%s1481_s0 + $0xa0] sm:$0xff]  ;;  %v1044_v29 = vld [vmem:[%s1481_s0 + $0xe8] sm:$0xff] }
   0xe   :  { %v1027_v30 = vld [vmem:[%s1481_s0 + $0x60] sm:$0xff]  ;;  %v1022_v31 = vld [vmem:[%s1481_s0 + $0x38] sm:$0xff]  ;;  %v1036_v32 = vld [vmem:[%s1481_s0 + $0xa8] sm:$0xff] }
   0xf   :  { %386 = vmatpush.bf16.msra.mxu0 %v1047_v5  ;;  %1064 = vmatpush.bf16.msra.mxu2 %v1047_v5  ;;  %v1045_v33 = vld [vmem:[%s1481_s0 + $0xf0] sm:$0xff]  ;;  %v1028_v34 = vld [vmem:[%s1481_s0 + $0x68] sm:$0xff]  ;;  %v1023_v35 = vld [vmem:[%s1481_s0 + $0x40] sm:$0xff] }
  0x10   :  { %1065 = vmatpush.bf16.msra.mxu3 %v1047_v5  ;;  %1063 = vmatpush.bf16.msra.mxu1 %v1047_v5  ;;  %v1037_v36 = vld [vmem:[%s1481_s0 + $0xb0] sm:$0xff]  ;;  %v1046_v38 = vld [vmem:[%s1481_s0 + $0xf8] sm:$0xff]  ;;  %v1298_v39 = vld [vmem:[%s1483_s2] ss:$0 sm:$0xff] }
  0x12   :  { %951 = vmatmul.msk.bf16.vlgmr.msra.gmra.mxu0 %vm278_vm1, %v1015_v6  ;;  %965 = vmatmul.msk.bf16.vlgmr.msra.gmra.mxu2 %vm278_vm1, %v1029_v7 }
  0x13   :  { %974 = vmatmul.msk.bf16.vlgmr.msra.gmra.mxu3 %vm278_vm1, %v1038_v8  ;;  %960 = vmatmul.msk.bf16.vlgmr.msra.gmra.mxu1 %vm278_vm1, %v1024_v18 }
  0x22   :  { %952 = vmatmul.msk.bf16.gmra.mxu0 %vm278_vm1, %v1016_v9  ;;  %966 = vmatmul.msk.bf16.gmra.mxu2 %vm278_vm1, %v1030_v10 }
  0x23   :  { %975 = vmatmul.msk.bf16.gmra.mxu3 %vm278_vm1, %v1039_v11  ;;  %961 = vmatmul.msk.bf16.gmra.mxu1 %vm278_vm1, %v1025_v22 }
  0x32   :  { %953 = vmatmul.msk.bf16.gmra.mxu0 %vm278_vm1, %v1017_v12  ;;  %967 = vmatmul.msk.bf16.gmra.mxu2 %vm278_vm1, %v1031_v13 }
  0x33   :  { %976 = vmatmul.msk.bf16.gmra.mxu3 %vm278_vm1, %v1040_v14  ;;  %962 = vmatmul.msk.bf16.gmra.mxu1 %vm278_vm1, %v1026_v26 }
  0x42   :  { %954 = vmatmul.msk.bf16.gmra.mxu0 %vm278_vm1, %v1018_v15  ;;  %968 = vmatmul.msk.bf16.gmra.mxu2 %vm278_vm1, %v1032_v16 }
  0x43   :  { %977 = vmatmul.msk.bf16.gmra.mxu3 %vm278_vm1, %v1041_v17  ;;  %963 = vmatmul.msk.bf16.gmra.mxu1 %vm278_vm1, %v1027_v30 }
  0x52   :  { %955 = vmatmul.msk.bf16.gmra.mxu0 %vm278_vm1, %v1019_v19  ;;  %969 = vmatmul.msk.bf16.gmra.mxu2 %vm278_vm1, %v1033_v20 }
  0x53   :  { %978 = vmatmul.msk.bf16.gmra.mxu3 %vm278_vm1, %v1042_v21  ;;  %964 = vmatmul.msk.bf16.gmra.mxu1 %vm278_vm1, %v1028_v34 }
  0x62   :  { %956 = vmatmul.msk.bf16.gmra.mxu0 %vm278_vm1, %v1020_v23  ;;  %970 = vmatmul.msk.bf16.gmra.mxu2 %vm278_vm1, %v1034_v24 }
  0x63   :  { %979 = vmatmul.msk.bf16.gmra.mxu3 %vm278_vm1, %v1043_v25 }
  0x72   :  { %957 = vmatmul.msk.bf16.gmra.mxu0 %vm278_vm1, %v1021_v27  ;;  %971 = vmatmul.msk.bf16.gmra.mxu2 %vm278_vm1, %v1035_v28 }
  0x73   :  { %980 = vmatmul.msk.bf16.gmra.mxu3 %vm278_vm1, %v1044_v29 }
  0x82   :  { %958 = vmatmul.msk.bf16.gmra.mxu0 %vm278_vm1, %v1022_v31  ;;  %972 = vmatmul.msk.bf16.gmra.mxu2 %vm278_vm1, %v1036_v32 }
  0x83   :  { %981 = vmatmul.msk.bf16.gmra.mxu3 %vm278_vm1, %v1045_v33 }
  0x8f   :  { %v388_v37 = vpop.f32.mrf.mxu0 }
  0x90   :  { %v389_v40 = vadd.f32 %v1298_v39, %v388_v37  ;;  %v1333_v24 = vpop.f32.mrf.mxu1 }
  0x92   :  { %959 = vmatmul.msk.bf16.gmra.mxu0 %vm278_vm1, %v1023_v35  ;;  %973 = vmatmul.msk.bf16.gmra.mxu2 %vm278_vm1, %v1037_v36  ;;  %v548_v44 = vmax.f32 %v389_v40, 0.0 }
  0x93   :  { %982 = vmatmul.msk.bf16.gmra.mxu3 %vm278_vm1, %v1046_v38 }
  0x95   :  { %v1304_v41 = vpop.f32.mrf.mxu2 }
  0x96   :  { %v1306_v42 = vpop.f32.mrf.mxu3 }
  0x97   :  { %v390_v43 = vpop.f32.mrf.mxu0 }
  0x98   :  { %v391_v45 = vadd.f32 %v1298_v39, %v390_v43  ;;  %v1337_v29 = vpop.f32.mrf.mxu1 }
  0x9a   :  { %v549_v46 = vmax.f32 %v391_v45, 0.0 }
  0x9c   :  { %v613_v47 = vadd.f32 %v549_v46, %v548_v44  ;;  %v1056_v46 = vld [vmem:[%s1484_s3 + $0x38] sm:$0xff] }
  0x9d   :  { %v1309_v48 = vpop.f32.mrf.mxu2  ;;  %769 = vmatpush.bf16.msrb.mxu1 %v1056_v46 }
  0x9e   :  { %v1311_v49 = vpop.f32.mrf.mxu3 }
  0x9f   :  { %v393_v50 = vpop.f32.mrf.mxu0 }
  0xa0   :  { %v394_v51 = vadd.f32 %v1298_v39, %v393_v50  ;;  %v1341_v34 = vpop.f32.mrf.mxu1 }
  0xa2   :  { %v550_v52 = vmax.f32 %v394_v51, 0.0 }
  0xa4   :  { %v614_v53 = vadd.f32 %v613_v47, %v550_v52 }
  0xa5   :  { %v1314_v54 = vpop.f32.mrf.mxu2 }
  0xa6   :  { %v1316_v56 = vpop.f32.mrf.mxu3 }
  0xa7   :  { %v395_v55 = vpop.f32.mrf.mxu0 }
  0xa8   :  { %v396_v57 = vadd.f32 %v1298_v39, %v395_v55  ;;  %v1345_v38 = vpop.f32.mrf.mxu1 }
  0xaa   :  { %v551_v58 = vmax.f32 %v396_v57, 0.0 }
  0xac   :  { %v615_v59 = vadd.f32 %v614_v53, %v551_v58 }
  0xad   :  { %v1319_v60 = vpop.f32.mrf.mxu2 }
  0xae   :  { %v1322_v63 = vpop.f32.mrf.mxu3 }
  0xaf   :  { %v398_v61 = vpop.f32.mrf.mxu0 }
  0xb0   :  { %v399_v62 = vadd.f32 %v1298_v39, %v398_v61  ;;  %v1349_v45 = vpop.f32.mrf.mxu1 }
  0xb2   :  { %v552_v0 = vmax.f32 %v399_v62, 0.0 }
  0xb4   :  { %v616_v1 = vadd.f32 %v615_v59, %v552_v0 }
  0xb5   :  { %v468_v2 = vpop.f32.mrf.mxu2 }
  0xb6   :  { %v1325_v6 = vpop.f32.mrf.mxu3  ;;  %v469_v7 = vadd.f32 %v1298_v39, %v468_v2 }
  0xb7   :  { %v400_v3 = vpop.f32.mrf.mxu0 }
  0xb8   :  { %v401_v4 = vadd.f32 %v1298_v39, %v400_v3  ;;  %v580_v12 = vmax.f32 %v469_v7, 0.0  ;;  %v1356_v53 = vpop.f32.mrf.mxu1 }
  0xba   :  { %v553_v5 = vmax.f32 %v401_v4, 0.0 }
  0xbc   :  { %v617_v8 = vadd.f32 %v616_v1, %v553_v5 }
  0xbd   :  { %v470_v9 = vpop.f32.mrf.mxu2 }
  0xbe   :  { %v471_v10 = vadd.f32 %v1298_v39, %v470_v9  ;;  %v1330_v19 = vpop.f32.mrf.mxu3 }
  0xbf   :  { %v403_v11 = vpop.f32.mrf.mxu0 }
  0xc0   :  { %v581_v13 = vmax.f32 %v471_v10, 0.0  ;;  %v404_v14 = vadd.f32 %v1298_v39, %v403_v11  ;;  %v1366_v7 = vpop.f32.mrf.mxu1 }
  0xc2   :  { %v650_v15 = vadd.f32 %v581_v13, %v580_v12  ;;  %v554_v16 = vmax.f32 %v404_v14, 0.0 }
  0xc4   :  { %v618_v17 = vadd.f32 %v617_v8, %v554_v16 }
  0xc5   :  { %v473_v18 = vpop.f32.mrf.mxu2 }
  0xc6   :  { %v474_v20 = vadd.f32 %v1298_v39, %v473_v18  ;;  %v1335_v27 = vpop.f32.mrf.mxu3 }
  0xc7   :  { %v405_v21 = vpop.f32.mrf.mxu0 }
  0xc8   :  { %v582_v22 = vmax.f32 %v474_v20, 0.0  ;;  %v406_v57 = vadd.f32 %v1298_v39, %v405_v21 }
  0xca   :  { %v651_v23 = vadd.f32 %v650_v15, %v582_v22  ;;  %v555_v61 = vmax.f32 %v406_v57, 0.0 }
  0xcc   :  { %v619_v8 = vadd.f32 %v618_v17, %v555_v61 }
  0xcd   :  { %v475_v25 = vpop.f32.mrf.mxu2 }
  0xce   :  { %v1339_v31 = vpop.f32.mrf.mxu3  ;;  %v476_v0 = vadd.f32 %v1298_v39, %v475_v25 }
  0xcf   :  { %v408_v26 = vpop.f32.mrf.mxu0 }
  0xd0   :  { %v409_v59 = vadd.f32 %v1298_v39, %v408_v26  ;;  %v583_v11 = vmax.f32 %v476_v0, 0.0  ;;  %v1382_v0 = vpop.f32.mrf.mxu1 }
  0xd2   :  { %v556_v2 = vmax.f32 %v409_v59, 0.0  ;;  %v652_v17 = vadd.f32 %v651_v23, %v583_v11  ;;  %v1055_v23 = vld [vmem:[%s1484_s3 + $0x30] sm:$0xff] }
  0xd3   :  { %770 = vmatpush.bf16.msrb.mxu1 %v1055_v23 }
  0xd4   :  { %v620_v13 = vadd.f32 %v619_v8, %v556_v2 }
  0xd5   :  { %v478_v28 = vpop.f32.mrf.mxu2 }
  0xd6   :  { %v1343_v35 = vpop.f32.mrf.mxu3  ;;  %v479_v4 = vadd.f32 %v1298_v39, %v478_v28 }
  0xd7   :  { %v410_v30 = vpop.f32.mrf.mxu0 }
  0xd8   :  { %v411_v62 = vadd.f32 %v1298_v39, %v410_v30  ;;  %v584_v16 = vmax.f32 %v479_v4, 0.0 }
  0xda   :  { %v557_v9 = vmax.f32 %v411_v62, 0.0  ;;  %v653_v46 = vadd.f32 %v652_v17, %v584_v16 }
  0xdc   :  { %v621_v21 = vadd.f32 %v620_v13, %v557_v9 }
  0xdd   :  { %v480_v32 = vpop.f32.mrf.mxu2 }
  0xde   :  { %v1347_v43 = vpop.f32.mrf.mxu3  ;;  %v481_v12 = vadd.f32 %v1298_v39, %v480_v32 }
  0xdf   :  { %v413_v33 = vpop.f32.mrf.mxu0 }
  0xe0   :  { %v414_v3 = vadd.f32 %v1298_v39, %v413_v33  ;;  %v585_v26 = vmax.f32 %v481_v12, 0.0 }
  0xe2   :  { %v558_v14 = vmax.f32 %v414_v3, 0.0 }
  0xe4   :  { %v622_v33 = vadd.f32 %v621_v21, %v558_v14 }
  0xe5   :  { %v483_v36 = vpop.f32.mrf.mxu2 }
  0xe6   :  { %v1354_v51 = vpop.f32.mrf.mxu3  ;;  %v484_v18 = vadd.f32 %v1298_v39, %v483_v36 }
  0xe7   :  { %v415_v37 = vpop.f32.mrf.mxu0 }
  0xe8   :  { %v416_v10 = vadd.f32 %v1298_v39, %v415_v37 }
  0xea   :  { %v559_v22 = vmax.f32 %v416_v10, 0.0 }
  0xec   :  { %v623_v59 = vadd.f32 %v622_v33, %v559_v22 }
  0xed   :  { %v485_v40 = vpop.f32.mrf.mxu2 }
  0xee   :  { %v1359_v58 = vpop.f32.mrf.mxu3  ;;  %v486_v28 = vadd.f32 %v1298_v39, %v485_v40 }
  0xef   :  { %v418_v44 = vpop.f32.mrf.mxu0 }
  0xf0   :  { %v419_v15 = vadd.f32 %v1298_v39, %v418_v44  ;;  %v586_v44 = vmax.f32 %v484_v18, 0.0  ;;  %v587_v40 = vmax.f32 %v486_v28, 0.0  ;;  %v436_v28 = vadd.f32 %v1298_v39, %v1337_v29 }
  0xf1   :  { %v441_v29 = vadd.f32 %v1298_v39, %v1345_v38  ;;  %v1054_v38 = vld [vmem:[%s1484_s3 + $0x28] sm:$0xff] }
  0xf2   :  { %v560_v32 = vmax.f32 %v419_v15, 0.0  ;;  %771 = vmatpush.bf16.msrb.mxu1 %v1054_v38 }
  0xf4   :  { %v624_v2 = vadd.f32 %v623_v59, %v560_v32 }
  0xf5   :  { %v488_v47 = vpop.f32.mrf.mxu2 }
  0xf6   :  { %v1372_v20 = vpop.f32.mrf.mxu3  ;;  %v489_v57 = vadd.f32 %v1298_v39, %v488_v47 }
  0xf7   :  { %v420_v50 = vpop.f32.mrf.mxu0 }
  0xf8   :  { %v421_v25 = vadd.f32 %v1298_v39, %v420_v50  ;;  %v654_v50 = vadd.f32 %v653_v46, %v585_v26  ;;  %v588_v8 = vmax.f32 %v489_v57, 0.0 }
  0xfa   :  { %v561_v61 = vmax.f32 %v421_v25, 0.0  ;;  %v655_v47 = vadd.f32 %v654_v50, %v586_v44  ;;  %v453_v44 = vpop.f32.mrf.mxu1 }
  0xfc   :  { %v625_v9 = vadd.f32 %v624_v2, %v561_v61  ;;  %v656_v11 = vadd.f32 %v655_v47, %v587_v40  ;;  %v504_v61 = vadd.f32 %v1298_v39, %v1306_v42 }
  0xfd   :  { %v490_v52 = vpop.f32.mrf.mxu2 }
  0xfe   :  { %v1387_v13 = vpop.f32.mrf.mxu3  ;;  %v657_v21 = vadd.f32 %v656_v11, %v588_v8 }
  0xff   :  { %v423_v55 = vpop.f32.mrf.mxu0 }
 0x100   :  { %v424_v37 = vadd.f32 %v1298_v39, %v423_v55  ;;  %v491_v55 = vadd.f32 %v1298_v39, %v490_v52  ;;  %v434_v52 = vadd.f32 %v1298_v39, %v1333_v24  ;;  %v439_v24 = vadd.f32 %v1298_v39, %v1341_v34 }
 0x101   :  { %v444_v34 = vadd.f32 %v1298_v39, %v1349_v45 }
 0x102   :  { %v562_v3 = vmax.f32 %v424_v37, 0.0  ;;  %v589_v14 = vmax.f32 %v491_v55, 0.0  ;;  %v506_v55 = vadd.f32 %v1298_v39, %v1311_v49  ;;  %v594_v49 = vmax.f32 %v504_v61, 0.0 }
 0x104   :  { %v626_v15 = vadd.f32 %v625_v9, %v562_v3  ;;  %v658_v33 = vadd.f32 %v657_v21, %v589_v14  ;;  %v509_v9 = vadd.f32 %v1298_v39, %v1316_v56  ;;  %v511_v14 = vadd.f32 %v1298_v39, %v1322_v63  ;;  %v1053_v56 = vld [vmem:[%s1484_s3 + $0x20] sm:$0xff] }
 0x105   :  { %v493_v1 = vpop.f32.mrf.mxu2  ;;  %v514_v21 = vadd.f32 %v1298_v39, %v1325_v6  ;;  %v451_v63 = vadd.f32 %v1298_v39, %v1382_v0  ;;  %772 = vmatpush.bf16.msrb.mxu1 %v1053_v56 }
 0x106   :  { %v1407_v3 = vpop.f32.mrf.mxu3 }
 0x107   :  { %v425_v5 = vpop.f32.mrf.mxu0  ;;  %v573_v0 = vmax.f32 %v451_v63, 0.0 }
 0x108   :  { %v426_v62 = vadd.f32 %v1298_v39, %v425_v5  ;;  %v494_v5 = vadd.f32 %v1298_v39, %v493_v1 }
 0x10a   :  { %v563_v10 = vmax.f32 %v426_v62, 0.0  ;;  %v590_v25 = vmax.f32 %v494_v5, 0.0  ;;  %v567_v62 = vmax.f32 %v436_v28, 0.0  ;;  %v446_v5 = vadd.f32 %v1298_v39, %v1356_v53 }
 0x10b   :  { %v596_v53 = vmax.f32 %v509_v9, 0.0  ;;  %v597_v28 = vmax.f32 %v511_v14, 0.0 }
 0x10c   :  { %v627_v17 = vadd.f32 %v626_v15, %v563_v10  ;;  %v659_v57 = vadd.f32 %v658_v33, %v590_v25  ;;  %v569_v10 = vmax.f32 %v441_v29, 0.0  ;;  %v570_v15 = vmax.f32 %v444_v34, 0.0  ;;  %v455_v25 = vpop.f32.mrf.mxu1 }
 0x10d   :  { %v495_v30 = vpop.f32.mrf.mxu2  ;;  %v516_v33 = vadd.f32 %v1298_v39, %v1330_v19  ;;  %v456_v6 = vadd.f32 %v1298_v39, %v455_v25  ;;  %v521_v19 = vadd.f32 %v1298_v39, %v1339_v31  ;;  %v526_v31 = vadd.f32 %v1298_v39, %v1347_v43 }
 0x10e   :  { %v496_v16 = vadd.f32 %v1298_v39, %v495_v30  ;;  %v566_v30 = vmax.f32 %v434_v52, 0.0  ;;  %v531_v43 = vadd.f32 %v1298_v39, %v1359_v58 }
 0x10f   :  { %v428_v36 = vpop.f32.mrf.mxu0 }
 0x110   :  { %v429_v4 = vadd.f32 %v1298_v39, %v428_v36  ;;  %v591_v32 = vmax.f32 %v496_v16, 0.0  ;;  %v449_v16 = vadd.f32 %v1298_v39, %v1366_v7  ;;  %v454_v7 = vadd.f32 %v1298_v39, %v453_v44 }
 0x111   :  { %v459_v44 = vadd.f32 %v1298_v39, %v1304_v41  ;;  %v464_v41 = vadd.f32 %v1298_v39, %v1314_v54  ;;  %v1052_v54 = vld [vmem:[%s1484_s3 + $0x18] sm:$0xff]  ;;  %v605_v56 = vmax.f32 %v531_v43, 0.0 }
 0x112   :  { %v564_v18 = vmax.f32 %v429_v4, 0.0  ;;  %v660_v50 = vadd.f32 %v659_v57, %v591_v32  ;;  %v568_v4 = vmax.f32 %v439_v24, 0.0  ;;  %v572_v32 = vmax.f32 %v449_v16, 0.0  ;;  %v540_v57 = vpop.f32.mrf.mxu3  ;;  %773 = vmatpush.bf16.msrb.mxu1 %v1052_v54 }
 0x113   :  { %v519_v24 = vadd.f32 %v1298_v39, %v1335_v27  ;;  %v574_v61 = vmax.f32 %v454_v7, 0.0  ;;  %v524_v27 = vadd.f32 %v1298_v39, %v1343_v35  ;;  %v529_v35 = vadd.f32 %v1298_v39, %v1354_v51 }
 0x114   :  { %v628_v37 = vadd.f32 %v627_v17, %v564_v18  ;;  %v1123_v17 = vmov 0.0   ;;  %v534_v51 = vadd.f32 %v1298_v39, %v1372_v20  ;;  %v539_v20 = vadd.f32 %v1298_v39, %v1407_v3 }
 0x115   :  { %v498_v12 = vpop.f32.mrf.mxu2  ;;  %29 = vst [vmem:[#allocation2] sm:$0x3] %v1123_v17  ;;  %v602_v9 = vmax.f32 %v524_v27, 0.0 }
 0x116   :  { %v499_v26 = vadd.f32 %v1298_v39, %v498_v12  ;;  %v595_v12 = vmax.f32 %v506_v55, 0.0  ;;  %v606_v25 = vmax.f32 %v534_v51, 0.0 }
 0x117   :  { %v430_v22 = vpop.f32.mrf.mxu0 }
 0x118   :  { %v431_v1 = vadd.f32 %v1298_v39, %v430_v22  ;;  %v592_v36 = vmax.f32 %v499_v26, 0.0  ;;  %v571_v22 = vmax.f32 %v446_v5, 0.0 }
 0x11a   :  { %v565_v46 = vmax.f32 %v431_v1, 0.0  ;;  %v661_v47 = vadd.f32 %v660_v50, %v592_v36  ;;  %v575_v50 = vmax.f32 %v456_v6, 0.0 }
 0x11c   :  { %v629_v59 = vadd.f32 %v628_v37, %v565_v46  ;;  %v612_v27 = vld [vmem:[#allocation2] sm:$0x3] }
 0x11d   :  { %v500_v23 = vpop.f32.mrf.mxu2 }
 0x11e   :  { %v630_v40 = vadd.f32 %v629_v59, %v566_v30  ;;  %v501_v2 = vadd.f32 %v1298_v39, %v500_v23  ;;  %v598_v30 = vmax.f32 %v514_v21, 0.0 }
 0x120   :  { %v631_v42 = vadd.f32 %v630_v40, %v567_v62  ;;  %v593_v8 = vmax.f32 %v501_v2, 0.0  ;;  %v599_v62 = vmax.f32 %v516_v33, 0.0  ;;  %v461_v40 = vadd.f32 %v1298_v39, %v1309_v48 }
 0x121   :  { %v600_v2 = vmax.f32 %v519_v24, 0.0  ;;  %v466_v48 = vadd.f32 %v1298_v39, %v1319_v60 }
 0x122   :  { %v632_v11 = vadd.f32 %v631_v42, %v568_v4  ;;  %v662_v45 = vadd.f32 %v661_v47, %v593_v8  ;;  %v576_v4 = vmax.f32 %v459_v44, 0.0  ;;  %v601_v47 = vmax.f32 %v521_v19, 0.0 }
 0x123   :  { %v577_v38 = vmax.f32 %v461_v40, 0.0  ;;  %v579_v60 = vmax.f32 %v466_v48, 0.0 }
 0x124   :  { %v633_v18 = vadd.f32 %v632_v11, %v569_v10  ;;  %v663_v52 = vadd.f32 %v662_v45, %v594_v49  ;;  %v578_v10 = vmax.f32 %v464_v41, 0.0  ;;  %v543_v11 = vpop.f32.mrf.mxu3  ;;  %v603_v45 = vmax.f32 %v526_v31, 0.0  ;;  %v1070_v31 = vld [vmem:[%s1485_s4] ss:$0 sm:$0xff] }
 0x126   :  { %v634_v26 = vadd.f32 %v633_v18, %v570_v15  ;;  %v664_v1 = vadd.f32 %v663_v52, %v595_v12  ;;  %v604_v15 = vmax.f32 %v529_v35, 0.0  ;;  %v1051_v52 = vld [vmem:[%s1484_s3 + $0x10] sm:$0xff] }
 0x127   :  { %774 = vmatpush.bf16.msrb.mxu1 %v1051_v52 }
 0x128   :  { %v635_v37 = vadd.f32 %v634_v26, %v571_v22  ;;  %v665_v46 = vadd.f32 %v664_v1, %v596_v53  ;;  %v536_v53 = vadd.f32 %v1298_v39, %v1387_v13  ;;  %v1050_v22 = vld [vmem:[%s1484_s3 + $0x8] sm:$0xff]  ;;  %v541_v1 = vadd.f32 %v1298_v39, %v540_v57  ;;  %v1049_v13 = vld [vmem:[%s1484_s3] sm:$0xff]  ;;  %s1124_s3 = smov [#allocation3]  }
 0x129   :  { %s788_s8 = sshll.u32 %s1124_s3, 4  ;;  %s789_s8 = int_to_ptr.vmem [resolvable:$true] %s788_s8 }
 0x12a   :  { %v636_v36 = vadd.f32 %v635_v37, %v572_v32  ;;  %v666_v59 = vadd.f32 %v665_v46, %v597_v28  ;;  %v607_v63 = vmax.f32 %v536_v53, 0.0  ;;  %v608_v28 = vmax.f32 %v539_v20, 0.0 }
 0x12b   :  { %775 = vmatpush.bf16.msrb.mxu1 %v1050_v22  ;;  %v544_v37 = vadd.f32 %v1298_v39, %v543_v11  ;;  %v609_v6 = vmax.f32 %v541_v1, 0.0 }
 0x12c   :  { %v637_v23 = vadd.f32 %v636_v36, %v573_v0  ;;  %v667_v29 = vadd.f32 %v666_v59, %v598_v30  ;;  %v545_v7 = vpop.f32.mrf.mxu3 }
 0x12d   :  { %v546_v3 = vadd.f32 %v1298_v39, %v545_v7  ;;  %v610_v0 = vmax.f32 %v544_v37, 0.0 }
 0x12e   :  { %v668_v55 = vadd.f32 %v667_v29, %v599_v62  ;;  %v638_v34 = vadd.f32 %v637_v23, %v574_v61 }
 0x12f   :  { %776 = vmatpush.bf16.msrb.mxu1 %v1049_v13  ;;  %v611_v36 = vmax.f32 %v546_v3, 0.0 }
 0x130   :  { %v669_v42 = vadd.f32 %v668_v55, %v600_v2  ;;  %v639_v8 = vadd.f32 %v638_v34, %v575_v50 }
 0x132   :  { %v670_v5 = vadd.f32 %v669_v42, %v601_v47  ;;  %v640_v49 = vadd.f32 %v639_v8, %v576_v4 }
 0x134   :  { %v671_v12 = vadd.f32 %v670_v5, %v602_v9  ;;  %v641_v14 = vadd.f32 %v640_v49, %v577_v38 }
 0x136   :  { %v672_v16 = vadd.f32 %v671_v12, %v603_v45  ;;  %v642_v18 = vadd.f32 %v641_v14, %v578_v10 }
 0x138   :  { %v673_v21 = vadd.f32 %v672_v16, %v604_v15  ;;  %v643_v58 = vadd.f32 %v642_v18, %v579_v60 }
 0x13a   :  { %v674_v17 = vadd.f32 %v673_v21, %v605_v56  ;;  %v644_v32 = vrot.slane %v643_v58, 4 }
 0x13c   :  { %v675_v26 = vadd.f32 %v674_v17, %v606_v25  ;;  %v645_v24 = vadd.f32 %v644_v32, %v643_v58 }
 0x13e   :  { %v676_v33 = vadd.f32 %v675_v26, %v607_v63  ;;  %v646_v59 = vrot.slane %v645_v24, 2 }
 0x140   :  { %v677_v46 = vadd.f32 %v676_v33, %v608_v28  ;;  %v647_v62 = vadd.f32 %v646_v59, %v645_v24 }
 0x142   :  { %v678_v30 = vadd.f32 %v677_v46, %v609_v6  ;;  %v648_v29 = vrot.slane %v647_v62, 1 }
 0x144   :  { %v679_v57 = vadd.f32 %v678_v30, %v610_v0  ;;  %v649_v2 = vadd.f32 %v648_v29, %v647_v62 }
 0x146   :  { %v680_v61 = vadd.f32 %v679_v57, %v611_v36 }
 0x148   :  { %v681_v44 = vrot.slane %v680_v61, 4 }
 0x14a   :  { %v682_v19 = vadd.f32 %v681_v44, %v680_v61 }
 0x14c   :  { %v683_v23 = vrot.slane %v682_v19, 2 }
 0x14e   :  { %v684_v50 = vadd.f32 %v683_v23, %v682_v19 }
 0x150   :  { %v685_v40 = vrot.slane %v684_v50, 1 }
 0x152   :  { %v686_v55 = vadd.f32 %v685_v40, %v684_v50 }
 0x154   :  { %v690_v39 = vsel %vm689_vm2, %v686_v55, %v649_v2 }
 0x155   :  { %v692_v34 = vadd.f32 %v690_v39, %v612_v27 }
 0x157   :  { %693 = vst [vmem:[#allocation2] sm:$0x3] %v692_v34 }
 0x15e   :  { %v697_v4 = vld [vmem:[#allocation2] sm:$0x3] }
 0x15f   :  { %v698_v41 = vmul.f32 0.00390625, %v697_v4 }
 0x161   :  { %v700_v47 = vpack.c.bf16 %v698_v41, %v698_v41  ;;  %699 = vst [vmem:[#allocation3] sm:$0x3] %v698_v41 }
 0x162   :  { %793 = dma.vmem_to_hbm [thread:$0]  %s789_s8, 32, %s791_s10, [#allocation4]  }
 0x163   :  { %777 = vmatmul.bf16.vlgmr.msrb.gmra.mxu1 %v700_v47 }
 0x1e0   :  { %v778_v42 = vpop.f32.mrf.mxu1 }
 0x1e1   :  { %v779_v8 = vadd.f32 %v1070_v31, %v778_v42 }
 0x1e3   :  { %782 = vst [vmem:[#allocation5] sm:$0x3] %v779_v8 }
 0x1e4   :  { %804 = dma.vmem_to_hbm [thread:$0]  %s800_s14, 32, %s802_s17, [#allocation6]  }
 0x1e8   :  { %v780_v38 = vpop.f32.mrf.mxu1 }
 0x1e9   :  { %1119 = dma.done.wait [#allocation4], 32  }
 0x1ea   :  { %1120 = vsyncadd [#allocation4], 4294967264 }
 0x1eb   :  { %1121 = dma.done.wait [#allocation6], 32  }
 0x1ec   :  { %1122 = vsyncadd [#allocation6], 4294967264 }
 0x1ed   :  { %813 = vsyncpa [#allocation4], 1 }
 0x1ee   :  { %814 = vsyncpa [#allocation6], 1 }

</bundles_post_ra>
